<compile_context>
chip_gen: v7x
topology: tpu7x:2x2x1
jax: 0.10.0
libtpu: 0.0.40
codegen_flags: <defaults>
</compile_context>

<pallas_src>
import jax
import jax.numpy as jnp
import numpy as np
from jax.experimental import pallas as pl
from jax.experimental.pallas import tpu as pltpu

IN_DIM = 640
H1_DIM = 256
H2_DIM = 64
OUT_DIM = 37


def pre_discriminator_kernel(
    slopes_ref,  # SMEM (2,)       f32  [a1, a2]
    x_ref,       # VMEM (TM, 640)  f32 (or bf16) input tile
    w1_ref,      # VMEM (640, 256) bf16
    b1_ref,      # VMEM (1, 256)   f32
    w2_ref,      # VMEM (256, 64)  bf16
    b2_ref,      # VMEM (1, 64)    f32
    w3_ref,      # VMEM (64, 37)   bf16
    b3_ref,      # VMEM (1, 37)    f32
    o_ref,       # VMEM (TM, 37)   f32
):
    a1 = slopes_ref[0]
    a2 = slopes_ref[1]

    # Cast to bf16 in-kernel (removes a separate HBM cast pass in the wrapper).
    x = x_ref[...].astype(jnp.bfloat16)

    # Linear(640, 256) + PReLU  (bf16 MXU, f32 accumulate, f32 elementwise)
    h = jnp.dot(x, w1_ref[...], preferred_element_type=jnp.float32) + b1_ref[...]
    h = jnp.where(h > 0, h, a1 * h)

    # Linear(256, 64) + PReLU
    h = jnp.dot(h.astype(jnp.bfloat16), w2_ref[...],
                preferred_element_type=jnp.float32) + b2_ref[...]
    h = jnp.where(h > 0, h, a2 * h)

    # Linear(64, 37) -> stored straight to the (TM, 37) output tile.
    o_ref[...] = (jnp.dot(h.astype(jnp.bfloat16), w3_ref[...],
                          preferred_element_type=jnp.float32)
                  + b3_ref[...]).astype(o_ref.dtype)


def _round_up(n, m):
    return ((n + m - 1) // m) * m


def pre_discriminator_forward(x, params, *, tm=1024):
    """x: [B, 640] (f32 or bf16). params: dict of f32 weights. Returns [B, 37] f32."""
    B = x.shape[0]
    # Large tiles amortize the ~0.35 us/step grid overhead; cap TM so the grid
    # has >=2 steps when possible ("parallel" axis can shard across 2 TCs).
    TM = max(8, min(tm, _round_up((B + 1) // 2, 8)))
    grid = ((B + TM - 1) // TM,)

    w1 = params["w1"].astype(jnp.bfloat16)
    w2 = params["w2"].astype(jnp.bfloat16)
    w3 = params["w3"].astype(jnp.bfloat16)
    b1 = params["b1"].astype(jnp.float32)
    b2 = params["b2"].astype(jnp.float32)
    b3 = params["b3"].astype(jnp.float32)
    slopes = jnp.concatenate(
        [params["a1"].reshape(-1), params["a2"].reshape(-1)]
    ).astype(jnp.float32)  # (2,)

    const = lambda i: (0, 0)  # weights/biases pinned resident in VMEM

    return pl.pallas_call(
        pre_discriminator_kernel,
        out_shape=jax.ShapeDtypeStruct((B, OUT_DIM), jnp.float32),
        grid=grid,
        in_specs=[
            pl.BlockSpec(memory_space=pltpu.MemorySpace.SMEM),      # slopes
            pl.BlockSpec((TM, IN_DIM), lambda i: (i, 0)),           # x tile
            pl.BlockSpec((IN_DIM, H1_DIM), const),                  # w1
            pl.BlockSpec((1, H1_DIM), const),                       # b1
            pl.BlockSpec((H1_DIM, H2_DIM), const),                  # w2
            pl.BlockSpec((1, H2_DIM), const),                       # b2
            pl.BlockSpec((H2_DIM, OUT_DIM), const),                 # w3
            pl.BlockSpec((1, OUT_DIM), const),                      # b3
        ],
        out_specs=pl.BlockSpec((TM, OUT_DIM), lambda i: (i, 0)),
        compiler_params=pltpu.CompilerParams(
            dimension_semantics=("parallel",)),
    )(slopes, x, w1, b1, w2, b2, w3, b3)


def init_params(key):
    """Deterministic synthetic init (PyTorch-Linear-like uniform ranges)."""
    ks = jax.random.split(key, 6)

    def linear(kw, kb, fan_in, fan_out):
        bound = 1.0 / np.sqrt(fan_in)
        w = jax.random.uniform(kw, (fan_in, fan_out), jnp.float32, -bound, bound)
        b = jax.random.uniform(kb, (1, fan_out), jnp.float32, -bound, bound)
        return w, b

    w1, b1 = linear(ks[0], ks[1], IN_DIM, H1_DIM)
    w2, b2 = linear(ks[2], ks[3], H1_DIM, H2_DIM)
    w3, b3 = linear(ks[4], ks[5], H2_DIM, OUT_DIM)
    a1 = jnp.full((1, 1), 0.25, jnp.float32)  # PReLU default init (scalar slope)
    a2 = jnp.full((1, 1), 0.25, jnp.float32)
    return {"w1": w1, "b1": b1, "a1": a1,
            "w2": w2, "b2": b2, "a2": a2,
            "w3": w3, "b3": b3}


def reference_forward(x, p):
    """Pure-f32 JAX reference matching the PyTorch module."""
    h = x @ p["w1"] + p["b1"]
    h = jnp.where(h > 0, h, p["a1"][0, 0] * h)
    h = h @ p["w2"] + p["b2"]
    h = jnp.where(h > 0, h, p["a2"][0, 0] * h)
    return h @ p["w3"] + p["b3"]


if __name__ == "__main__":
    key = jax.random.PRNGKey(0)
    k_x, k_p = jax.random.split(key)
    params = init_params(k_p)

    # Main small-shape run.
    B = 8
    x = jax.random.normal(k_x, (B, IN_DIM), jnp.float32)
    out = jax.block_until_ready(pre_discriminator_forward(x, params))
    ref = jax.block_until_ready(reference_forward(x, params))
    assert out.shape == (B, OUT_DIM)
    # bf16 matmul inputs with f32 accumulation -> modest tolerance vs f32 ref.
    np.testing.assert_allclose(np.asarray(out), np.asarray(ref),
                               rtol=5e-2, atol=5e-2)

    # Ragged batch (B not a multiple of the tile): exercises the masked last tile.
    B2 = 13
    x2 = jax.random.normal(k_x, (B2, IN_DIM), jnp.float32)
    out2 = jax.block_until_ready(pre_discriminator_forward(x2, params))
    ref2 = jax.block_until_ready(reference_forward(x2, params))
    assert out2.shape == (B2, OUT_DIM)
    np.testing.assert_allclose(np.asarray(out2), np.asarray(ref2),
                               rtol=5e-2, atol=5e-2)

    print("KERNEL_OK")
</pallas_src>

<mosaic_0001>
module attributes {stable_mosaic.version = 11 : i64} {
  func.func @pre_discriminator_kernel(%arg0: i32, %arg1: memref<2xf32, #tpu.memory_space<smem>>, %arg2: memref<8x640xf32, #tpu.memory_space<vmem>>, %arg3: memref<640x256xbf16, #tpu.memory_space<vmem>>, %arg4: memref<1x256xf32, #tpu.memory_space<vmem>>, %arg5: memref<256x64xbf16, #tpu.memory_space<vmem>>, %arg6: memref<1x64xf32, #tpu.memory_space<vmem>>, %arg7: memref<64x37xbf16, #tpu.memory_space<vmem>>, %arg8: memref<1x37xf32, #tpu.memory_space<vmem>>, %arg9: memref<8x37xf32, #tpu.memory_space<vmem>>) attributes {dimension_semantics = [#tpu.dimension_semantics<parallel>], iteration_bounds = array<i64: 1>, scalar_prefetch = 0 : i64, scratch_operands = 0 : i64, tpu.core_type = #tpu.core_type<tc>, window_params = [{transform_indices = @transform_0, window_bounds = array<i64: 2>}, {transform_indices = @transform_1, window_bounds = array<i64: 8, 640>}, {pipeline_mode = #tpu.pipeline_mode<synchronous>, transform_indices = @transform_2, window_bounds = array<i64: 640, 256>}, {pipeline_mode = #tpu.pipeline_mode<synchronous>, transform_indices = @transform_3, window_bounds = array<i64: 1, 256>}, {pipeline_mode = #tpu.pipeline_mode<synchronous>, transform_indices = @transform_4, window_bounds = array<i64: 256, 64>}, {pipeline_mode = #tpu.pipeline_mode<synchronous>, transform_indices = @transform_5, window_bounds = array<i64: 1, 64>}, {pipeline_mode = #tpu.pipeline_mode<synchronous>, transform_indices = @transform_6, window_bounds = array<i64: 64, 37>}, {pipeline_mode = #tpu.pipeline_mode<synchronous>, transform_indices = @transform_7, window_bounds = array<i64: 1, 37>}, {transform_indices = @transform_8, window_bounds = array<i64: 8, 37>}]} {
    %c0 = arith.constant 0 : index
    %0 = memref.load %arg1[%c0] : memref<2xf32, #tpu.memory_space<smem>>
    %c1 = arith.constant 1 : index
    %1 = memref.load %arg1[%c1] : memref<2xf32, #tpu.memory_space<smem>>
    %c0_0 = arith.constant 0 : index
    %c0_1 = arith.constant 0 : index
    %2 = vector.load %arg2[%c0_0, %c0_1] : memref<8x640xf32, #tpu.memory_space<vmem>>, vector<8x640xf32>
    %3 = arith.truncf %2 : vector<8x640xf32> to vector<8x640xbf16>
    %c0_2 = arith.constant 0 : index
    %c0_3 = arith.constant 0 : index
    %4 = vector.load %arg3[%c0_2, %c0_3] : memref<640x256xbf16, #tpu.memory_space<vmem>>, vector<640x256xbf16>
    %cst = arith.constant dense<0.000000e+00> : vector<8x256xf32>
    %5 = tpu.matmul %3, %4, %cst {dimension_numbers = #tpu.dot_dimension_numbers<[1], [0], [0], [1], [0, 0, 1, 1], [], []>} : vector<8x640xbf16>, vector<640x256xbf16>, vector<8x256xf32> -> vector<8x256xf32>
    %c0_4 = arith.constant 0 : index
    %c0_5 = arith.constant 0 : index
    %6 = vector.load %arg4[%c0_4, %c0_5] : memref<1x256xf32, #tpu.memory_space<vmem>>, vector<1x256xf32>
    %7 = vector.broadcast %6 : vector<1x256xf32> to vector<8x256xf32>
    %8 = arith.addf %5, %7 : vector<8x256xf32>
    %cst_6 = arith.constant 0.000000e+00 : f32
    %9 = vector.broadcast %cst_6 : f32 to vector<8x256xf32>
    %10 = arith.cmpf ogt, %8, %9 : vector<8x256xf32>
    %11 = vector.broadcast %0 : f32 to vector<8x256xf32>
    %12 = arith.mulf %11, %8 : vector<8x256xf32>
    %13 = arith.select %10, %8, %12 : vector<8x256xi1>, vector<8x256xf32>
    %14 = arith.truncf %13 : vector<8x256xf32> to vector<8x256xbf16>
    %c0_7 = arith.constant 0 : index
    %c0_8 = arith.constant 0 : index
    %15 = vector.load %arg5[%c0_7, %c0_8] : memref<256x64xbf16, #tpu.memory_space<vmem>>, vector<256x64xbf16>
    %cst_9 = arith.constant dense<0.000000e+00> : vector<8x64xf32>
    %16 = tpu.matmul %14, %15, %cst_9 {dimension_numbers = #tpu.dot_dimension_numbers<[1], [0], [0], [1], [0, 0, 1, 1], [], []>} : vector<8x256xbf16>, vector<256x64xbf16>, vector<8x64xf32> -> vector<8x64xf32>
    %c0_10 = arith.constant 0 : index
    %c0_11 = arith.constant 0 : index
    %17 = vector.load %arg6[%c0_10, %c0_11] : memref<1x64xf32, #tpu.memory_space<vmem>>, vector<1x64xf32>
    %18 = vector.broadcast %17 : vector<1x64xf32> to vector<8x64xf32>
    %19 = arith.addf %16, %18 : vector<8x64xf32>
    %cst_12 = arith.constant 0.000000e+00 : f32
    %20 = vector.broadcast %cst_12 : f32 to vector<8x64xf32>
    %21 = arith.cmpf ogt, %19, %20 : vector<8x64xf32>
    %22 = vector.broadcast %1 : f32 to vector<8x64xf32>
    %23 = arith.mulf %22, %19 : vector<8x64xf32>
    %24 = arith.select %21, %19, %23 : vector<8x64xi1>, vector<8x64xf32>
    %25 = arith.truncf %24 : vector<8x64xf32> to vector<8x64xbf16>
    %c0_13 = arith.constant 0 : index
    %c0_14 = arith.constant 0 : index
    %26 = vector.load %arg7[%c0_13, %c0_14] : memref<64x37xbf16, #tpu.memory_space<vmem>>, vector<64x37xbf16>
    %cst_15 = arith.constant dense<0.000000e+00> : vector<8x37xf32>
    %27 = tpu.matmul %25, %26, %cst_15 {dimension_numbers = #tpu.dot_dimension_numbers<[1], [0], [0], [1], [0, 0, 1, 1], [], []>} : vector<8x64xbf16>, vector<64x37xbf16>, vector<8x37xf32> -> vector<8x37xf32>
    %c0_16 = arith.constant 0 : index
    %c0_17 = arith.constant 0 : index
    %28 = vector.load %arg8[%c0_16, %c0_17] : memref<1x37xf32, #tpu.memory_space<vmem>>, vector<1x37xf32>
    %29 = vector.broadcast %28 : vector<1x37xf32> to vector<8x37xf32>
    %30 = arith.addf %27, %29 : vector<8x37xf32>
    %c0_18 = arith.constant 0 : index
    %c0_19 = arith.constant 0 : index
    %31 = vector.load %arg9[%c0_18, %c0_19] : memref<8x37xf32, #tpu.memory_space<vmem>>, vector<8x37xf32>
    tpu.vector_store %arg9[%c0_18, %c0_19], %30 {strides = array<i32>} : memref<8x37xf32, #tpu.memory_space<vmem>>, vector<8x37xf32>,
    return
  }
  func.func @transform_0(%arg0: i32) -> i32 {
    %c0_i32 = arith.constant 0 : i32
    %c0_i32_0 = arith.constant 0 : i32
    return %c0_i32 : i32
  }
  func.func @transform_1(%arg0: i32) -> (i32, i32) {
    %c0_i32 = arith.constant 0 : i32
    %c0_i32_0 = arith.constant 0 : i32
    return %arg0, %c0_i32 : i32, i32
  }
  func.func @transform_2(%arg0: i32) -> (i32, i32) {
    %c0_i32 = arith.constant 0 : i32
    %c0_i32_0 = arith.constant 0 : i32
    %c0_i32_1 = arith.constant 0 : i32
    return %c0_i32, %c0_i32_0 : i32, i32
  }
  func.func @transform_3(%arg0: i32) -> (i32, i32) {
    %c0_i32 = arith.constant 0 : i32
    %c0_i32_0 = arith.constant 0 : i32
    %c0_i32_1 = arith.constant 0 : i32
    return %c0_i32, %c0_i32_0 : i32, i32
  }
  func.func @transform_4(%arg0: i32) -> (i32, i32) {
    %c0_i32 = arith.constant 0 : i32
    %c0_i32_0 = arith.constant 0 : i32
    %c0_i32_1 = arith.constant 0 : i32
    return %c0_i32, %c0_i32_0 : i32, i32
  }
  func.func @transform_5(%arg0: i32) -> (i32, i32) {
    %c0_i32 = arith.constant 0 : i32
    %c0_i32_0 = arith.constant 0 : i32
    %c0_i32_1 = arith.constant 0 : i32
    return %c0_i32, %c0_i32_0 : i32, i32
  }
  func.func @transform_6(%arg0: i32) -> (i32, i32) {
    %c0_i32 = arith.constant 0 : i32
    %c0_i32_0 = arith.constant 0 : i32
    %c0_i32_1 = arith.constant 0 : i32
    return %c0_i32, %c0_i32_0 : i32, i32
  }
  func.func @transform_7(%arg0: i32) -> (i32, i32) {
    %c0_i32 = arith.constant 0 : i32
    %c0_i32_0 = arith.constant 0 : i32
    %c0_i32_1 = arith.constant 0 : i32
    return %c0_i32, %c0_i32_0 : i32, i32
  }
  func.func @transform_8(%arg0: i32) -> (i32, i32) {
    %c0_i32 = arith.constant 0 : i32
    %c0_i32_0 = arith.constant 0 : i32
    return %arg0, %c0_i32 : i32, i32
  }
}

</mosaic_0001>

<bundles_post_ra>
// kernel: tpu_custom_call.1
= control target key start
LH: loop header
LB: loop body
LE: loop exit
PB: predicated region body
PF: predicated region fallthrough
CT: control target
= control target key end

     0   :  { %13 = vsyncpa [#allocation5], 0  ;;  %s1500_s0 = inlined_call_operand.vmem [shape: f32[2], index: 0, kind: input, shape index: {}]   ;;  %s1501_s1 = inlined_call_operand.vmem [shape: f32[8,640], index: 1, kind: input, shape index: {}]   ;;  %s1502_s2 = inlined_call_operand.hbm [shape: bf16[640,256], index: 2, kind: input, shape index: {}]   ;;  %s1503_s3 = inlined_call_operand.vmem [shape: f32[1,256], index: 3, kind: input, shape index: {}]   ;;  %s1504_s4 = inlined_call_operand.vmem [shape: bf16[256,64], index: 4, kind: input, shape index: {}]   ;;  %s1505_s5 = inlined_call_operand.vmem [shape: f32[1,64], index: 5, kind: input, shape index: {}]   ;;  %s1506_s6 = inlined_call_operand.vmem [shape: bf16[64,37], index: 6, kind: input, shape index: {}]   ;;  %s1507_s7 = inlined_call_operand.vmem [shape: f32[1,37], index: 7, kind: input, shape index: {}]   ;;  %s1508_s8 = inlined_call_operand.hbm [shape: f32[8,37], index: 8, kind: output, shape index: {}]  }
   0x1   :  { %14 = vsyncpa [#allocation3], 0 }
   0x2   :  { %15 = vsyncpa [#allocation4], 0  ;;  %s22_s29 = sshll.u32 %s1500_s0, 4  ;;  %s23_s29 = int_to_ptr.vmem [resolvable:$true] %s22_s29 }
   0x3   :  { %s1274_s30 = scalar_lea.vmem %s23_s29, 16  ;;  %p1279_p1 = scmp.lt.s32.totalorder %s23_s29, %s23_s29 }
   0x4   :  { %p1275_p0 = scmp.ne.s32.totalorder %s23_s29, %s1274_s30  ;;  %p1280_p2 = scmp.lt.s32.totalorder %s1274_s30, %s1274_s30 }
   0x6   :  { %p1281_p3 = por %p1280_p2, %p1279_p1 }
   0x8   :  { %p1282_p4 = pnand %p1281_p3, %p1275_p0 }
   0xa   :  { %1285 = shalt.err (!%p1282_p4)
}
   0xb   :  { %s1336_s9 = smov [#allocation2]   ;;  %s1337_s10 = smov [#allocation6]  }
   0xc   :  { %25 = dma.vmem_to_smem %s23_s29, 16, %s1336_s9, [#allocation5]  }
   0xd   :  { %s33_s11 = sshll.u32 %s1337_s10, 4  ;;  %s1286_s14 = scalar_lea.hbm %s1502_s2, 10240  ;;  %s34_s11 = int_to_ptr.vmem [resolvable:$true] %s33_s11 }
   0xe   :  { %p1287_p5 = scmp.ne.s32.totalorder %s1502_s2, %s1286_s14  ;;  %p1290_p6 = scmp.lt.u32.totalorder %s1286_s14, %s1502_s2 }
  0x10   :  { %p1292_p7 = pnand %p1290_p6, %p1287_p5 }
  0x12   :  { %1295 = shalt.err (!%p1292_p7)
}
  0x13   :  { %s1296_s18 = scalar_lea.vmem %s34_s11, 10240  ;;  %p1301_p9 = scmp.lt.s32.totalorder %s34_s11, %s34_s11 }
  0x14   :  { %p1297_p8 = scmp.ne.s32.totalorder %s34_s11, %s1296_s18  ;;  %p1302_p10 = scmp.lt.s32.totalorder %s1296_s18, %s1296_s18 }
  0x16   :  { %p1303_p11 = por %p1302_p10, %p1301_p9 }
  0x18   :  { %p1304_p12 = pnand %p1303_p11, %p1297_p8 }
  0x1a   :  { %1307 = shalt.err (!%p1304_p12)
}
  0x1b   :  { %s1338_s19 = smov 128   ;;  %s1339_s20 = smov 8  }
  0x1c   :  { %39 = dma.hbm_to_vmem [thread:$0]  %s1502_s2, 10240, %s34_s11, [#allocation3], %s1338_s19, %s1338_s19, %s1339_s20  }
  0x1d   :  { %1330 = dma.done.wait [#allocation5], 16  }
  0x1e   :  { %1331 = vsyncadd [#allocation5], 4294967280 }
  0x1f   :  { %1332 = dma.done.wait [#allocation3], 10240  }
  0x20   :  { %1333 = vsyncadd [#allocation3], 4294957056 }
  0x21   :  { %56 = sfence }
  0x22   :  { %v1134_v0 = vld [vmem:[#allocation6 + $0x104] ss:$8 sps:$4 sm:$0xff]   ;;  %v1136_v1 = vld [vmem:[#allocation6 + $0x100] ss:$8 sps:$4 sm:$0xff]   ;;  %v1137_v2 = vld [vmem:[#allocation6 + $0x114] ss:$8 sps:$4 sm:$0xff]  }
  0x23   :  { %603 = vmatprep.subr.bf16.mxu0 %v1134_v0  ;;  %v1139_v3 = vld [vmem:[#allocation6 + $0x110] ss:$8 sps:$4 sm:$0xff]   ;;  %v1140_v4 = vld [vmem:[#allocation6 + $0x124] ss:$8 sps:$4 sm:$0xff]   ;;  %v1142_v5 = vld [vmem:[#allocation6 + $0x120] ss:$8 sps:$4 sm:$0xff]  }
  0x24   :  { %604 = vmatpush1.bf16.msra.mxu0 %v1136_v1  ;;  %v1143_v6 = vld [vmem:[#allocation6 + $0x134] ss:$8 sps:$4 sm:$0xff]   ;;  %v1155_v7 = vld [vmem:[#allocation6 + $0x4] ss:$8 sps:$4 sm:$0xff]   ;;  %v1157_v8 = vld [vmem:[#allocation6] ss:$8 sps:$4 sm:$0xff]  }
  0x25   :  { %605 = vmatprep.subr.bf16.mxu0 %v1137_v2  ;;  %v1145_v9 = vld [vmem:[#allocation6 + $0x130] ss:$8 sps:$4 sm:$0xff]   ;;  %v1146_v10 = vld [vmem:[#allocation6 + $0x144] ss:$8 sps:$4 sm:$0xff]   ;;  %562 = vmatprep.subr.bf16.mxu1 %v1155_v7  ;;  %v1161_v11 = vld [vmem:[#allocation6 + $0x14] ss:$8 sps:$4 sm:$0xff]  }
  0x26   :  { %563 = vmatpush1.bf16.msra.mxu1 %v1157_v8  ;;  %v1163_v12 = vld [vmem:[#allocation6 + $0x10] ss:$8 sps:$4 sm:$0xff]   ;;  %v1148_v13 = vld [vmem:[#allocation6 + $0x140] ss:$8 sps:$4 sm:$0xff]   ;;  %v1167_v14 = vld [vmem:[#allocation6 + $0x24] ss:$8 sps:$4 sm:$0xff]  }
  0x27   :  { %564 = vmatprep.subr.bf16.mxu1 %v1161_v11  ;;  %v1149_v15 = vld [vmem:[#allocation6 + $0x154] ss:$8 sps:$4 sm:$0xff]   ;;  %v1169_v16 = vld [vmem:[#allocation6 + $0x20] ss:$8 sps:$4 sm:$0xff]   ;;  %v1151_v18 = vld [vmem:[#allocation6 + $0x150] ss:$8 sps:$4 sm:$0xff]  }
  0x28   :  { %606 = vmatpush1.bf16.msra.mxu0 %v1139_v3  ;;  %v1173_v17 = vld [vmem:[#allocation6 + $0x34] ss:$8 sps:$4 sm:$0xff]   ;;  %v1152_v19 = vld [vmem:[#allocation6 + $0x164] ss:$8 sps:$4 sm:$0xff]   ;;  %v1175_v20 = vld [vmem:[#allocation6 + $0x30] ss:$8 sps:$4 sm:$0xff]  }
  0x29   :  { %607 = vmatprep.subr.bf16.mxu0 %v1140_v4  ;;  %v1179_v21 = vld [vmem:[#allocation6 + $0x44] ss:$8 sps:$4 sm:$0xff]   ;;  %v1154_v22 = vld [vmem:[#allocation6 + $0x160] ss:$8 sps:$4 sm:$0xff]   ;;  %v1158_v23 = vld [vmem:[#allocation6 + $0x174] ss:$8 sps:$4 sm:$0xff]  }
  0x2a   :  { %565 = vmatpush1.bf16.msra.mxu1 %v1163_v12  ;;  %v1181_v24 = vld [vmem:[#allocation6 + $0x40] ss:$8 sps:$4 sm:$0xff]   ;;  %v1185_v25 = vld [vmem:[#allocation6 + $0x54] ss:$8 sps:$4 sm:$0xff]   ;;  %v1160_v26 = vld [vmem:[#allocation6 + $0x170] ss:$8 sps:$4 sm:$0xff]  }
  0x2b   :  { %566 = vmatprep.subr.bf16.mxu1 %v1167_v14  ;;  %v1164_v27 = vld [vmem:[#allocation6 + $0x184] ss:$8 sps:$4 sm:$0xff]   ;;  %v1187_v28 = vld [vmem:[#allocation6 + $0x50] ss:$8 sps:$4 sm:$0xff]   ;;  %v1166_v30 = vld [vmem:[#allocation6 + $0x180] ss:$8 sps:$4 sm:$0xff]  }
  0x2c   :  { %608 = vmatpush1.bf16.msra.mxu0 %v1142_v5  ;;  %v1191_v29 = vld [vmem:[#allocation6 + $0x64] ss:$8 sps:$4 sm:$0xff]   ;;  %v1170_v31 = vld [vmem:[#allocation6 + $0x194] ss:$8 sps:$4 sm:$0xff]   ;;  %v1193_v32 = vld [vmem:[#allocation6 + $0x60] ss:$8 sps:$4 sm:$0xff]  }
  0x2d   :  { %609 = vmatprep.subr.bf16.mxu0 %v1143_v6  ;;  %v1197_v33 = vld [vmem:[#allocation6 + $0x74] ss:$8 sps:$4 sm:$0xff]   ;;  %v1172_v35 = vld [vmem:[#allocation6 + $0x190] ss:$8 sps:$4 sm:$0xff]   ;;  %v1176_v37 = vld [vmem:[#allocation6 + $0x1a4] ss:$8 sps:$4 sm:$0xff]  }
  0x2e   :  { %567 = vmatpush1.bf16.msra.mxu1 %v1169_v16  ;;  %v63_v34 = vld [vmem:[%s1501_s1 + $0x18] sm:$0xff]  ;;  %v1203_v39 = vld [vmem:[#allocation6 + $0x84] ss:$8 sps:$4 sm:$0xff]   ;;  %v1178_v40 = vld [vmem:[#allocation6 + $0x1a0] ss:$8 sps:$4 sm:$0xff]   ;;  %v1340_v12 = vmov 0  }
  0x2f   :  { %568 = vmatprep.subr.bf16.mxu1 %v1173_v17  ;;  %v68_v36 = vpack.c.bf16 %v63_v34, %v63_v34  ;;  %v1199_v38 = vld [vmem:[#allocation6 + $0x70] ss:$8 sps:$4 sm:$0xff]   ;;  %v1182_v41 = vld [vmem:[#allocation6 + $0x1b4] ss:$8 sps:$4 sm:$0xff]   ;;  %v1205_v42 = vld [vmem:[#allocation6 + $0x80] ss:$8 sps:$4 sm:$0xff]  }
  0x30   :  { %610 = vmatpush1.bf16.msra.mxu0 %v1145_v9  ;;  %v1209_v43 = vld [vmem:[#allocation6 + $0x94] ss:$8 sps:$4 sm:$0xff]   ;;  %v1184_v44 = vld [vmem:[#allocation6 + $0x1b0] ss:$8 sps:$4 sm:$0xff]   ;;  %v1188_v45 = vld [vmem:[#allocation6 + $0x1c4] ss:$8 sps:$4 sm:$0xff]  }
  0x31   :  { %611 = vmatprep.subr.bf16.mxu0 %v1146_v10  ;;  %635 = vmatprep.mubr.bf16.mxu0 %v68_v36  ;;  %v1211_v46 = vld [vmem:[#allocation6 + $0x90] ss:$8 sps:$4 sm:$0xff]   ;;  %v1215_v47 = vld [vmem:[#allocation6 + $0xa4] ss:$8 sps:$4 sm:$0xff]   ;;  %v1190_v48 = vld [vmem:[#allocation6 + $0x1c0] ss:$8 sps:$4 sm:$0xff]  }
  0x32   :  { %569 = vmatpush1.bf16.msra.mxu1 %v1175_v20  ;;  %v1194_v49 = vld [vmem:[#allocation6 + $0x1d4] ss:$8 sps:$4 sm:$0xff]   ;;  %v1217_v50 = vld [vmem:[#allocation6 + $0xa0] ss:$8 sps:$4 sm:$0xff]   ;;  %v1196_v52 = vld [vmem:[#allocation6 + $0x1d0] ss:$8 sps:$4 sm:$0xff]  }
  0x33   :  { %570 = vmatprep.subr.bf16.mxu1 %v1179_v21  ;;  %v1221_v51 = vld [vmem:[#allocation6 + $0xb4] ss:$8 sps:$4 sm:$0xff]   ;;  %v1200_v53 = vld [vmem:[#allocation6 + $0x1e4] ss:$8 sps:$4 sm:$0xff]   ;;  %v1223_v55 = vld [vmem:[#allocation6 + $0xb0] ss:$8 sps:$4 sm:$0xff]  }
  0x34   :  { %612 = vmatpush1.bf16.msra.mxu0 %v1148_v13  ;;  %v61_v54 = vld [vmem:[%s1501_s1 + $0x8] sm:$0xff]  ;;  %v1206_v59 = vld [vmem:[#allocation6 + $0x1f4] ss:$8 sps:$4 sm:$0xff]   ;;  %v1208_v60 = vld [vmem:[#allocation6 + $0x1f0] ss:$8 sps:$4 sm:$0xff]   ;;  %s58_s18 = sld [smem:[#allocation2]] }
  0x35   :  { %613 = vmatprep.subr.bf16.mxu0 %v1149_v15  ;;  %v66_v56 = vpack.c.bf16 %v61_v54, %v61_v54  ;;  %v1227_v57 = vld [vmem:[#allocation6 + $0xc4] ss:$8 sps:$4 sm:$0xff]   ;;  %v1202_v58 = vld [vmem:[#allocation6 + $0x1e0] ss:$8 sps:$4 sm:$0xff]   ;;  %v1233_v62 = vld [vmem:[#allocation6 + $0xd4] ss:$8 sps:$4 sm:$0xff]  }
  0x36   :  { %571 = vmatpush1.bf16.msra.mxu1 %v1181_v24  ;;  %v1229_v61 = vld [vmem:[#allocation6 + $0xc0] ss:$8 sps:$4 sm:$0xff]   ;;  %v62_v63 = vld [vmem:[%s1501_s1 + $0x10] sm:$0xff]  ;;  %v1214_v0 = vld [vmem:[#allocation6 + $0x204] ss:$8 sps:$4 sm:$0xff]   ;;  %vm1342_vm2 = vmmov 0  }
  0x37   :  { %572 = vmatprep.subr.bf16.mxu1 %v1185_v25  ;;  %594 = vmatprep.mubr.bf16.mxu1 %v66_v56  ;;  %v1212_v1 = vld [vmem:[#allocation6 + $0x200] ss:$8 sps:$4 sm:$0xff]   ;;  %v1235_v2 = vld [vmem:[#allocation6 + $0xd0] ss:$8 sps:$4 sm:$0xff]   ;;  %v67_v3 = vpack.c.bf16 %v62_v63, %v62_v63  ;;  %v1220_v4 = vld [vmem:[#allocation6 + $0x214] ss:$8 sps:$4 sm:$0xff]  }
  0x38   :  { %614 = vmatpush1.bf16.msra.mxu0 %v1151_v18  ;;  %v1239_v5 = vld [vmem:[#allocation6 + $0xe4] ss:$8 sps:$4 sm:$0xff]   ;;  %v1241_v6 = vld [vmem:[#allocation6 + $0xe0] ss:$8 sps:$4 sm:$0xff]   ;;  %v1245_v7 = vld [vmem:[#allocation6 + $0xf4] ss:$8 sps:$4 sm:$0xff]  }
  0x39   :  { %615 = vmatprep.subr.bf16.mxu0 %v1152_v19  ;;  %v1218_v8 = vld [vmem:[#allocation6 + $0x210] ss:$8 sps:$4 sm:$0xff]   ;;  %v1226_v9 = vld [vmem:[#allocation6 + $0x224] ss:$8 sps:$4 sm:$0xff]   ;;  %v1224_v14 = vld [vmem:[#allocation6 + $0x220] ss:$8 sps:$4 sm:$0xff]  }
  0x3a   :  { %573 = vmatpush1.bf16.msra.mxu1 %v1187_v28  ;;  %v1247_v10 = vld [vmem:[#allocation6 + $0xf0] ss:$8 sps:$4 sm:$0xff]   ;;  %v60_v11 = vld [vmem:[%s1501_s1] sm:$0xff]  ;;  %v1232_v15 = vld [vmem:[#allocation6 + $0x234] ss:$8 sps:$4 sm:$0xff]   ;;  %s975_s24 = sld [smem:[#allocation2 + $0x1]] }
  0x3b   :  { %574 = vmatprep.subr.bf16.mxu1 %v1191_v29  ;;  %v1254_v13 = vld [vmem:[%s1504_s4 + $0x40] sm:$0xff]   ;;  %v65_v16 = vpack.c.bf16 %v60_v11, %v60_v11  ;;  %v1256_v18 = vld [vmem:[%s1504_s4 + $0x48] sm:$0xff]   ;;  %v1230_v19 = vld [vmem:[#allocation6 + $0x230] ss:$8 sps:$4 sm:$0xff]   ;;  %vm913_vm4 = vcmask 523264   ;;  %s1343_s28 = smov [#allocation7]  }
  0x3c   :  { %616 = vmatpush1.bf16.msra.mxu0 %v1154_v22  ;;  %v1255_v17 = vld [vmem:[%s1504_s4] sm:$0xff]   ;;  %v1257_v21 = vld [vmem:[%s1504_s4 + $0x8] sm:$0xff]   ;;  %v1258_v22 = vld [vmem:[%s1504_s4 + $0x50] sm:$0xff]   ;;  %s965_s29 = sshll.u32 %s1343_s28, 4  ;;  %vm957_vm5 = vcmask 302080   ;;  %s966_s29 = int_to_ptr.vmem [resolvable:$true] %s965_s29 }
  0x3d   :  { %617 = vmatprep.subr.bf16.mxu0 %v1158_v23  ;;  %v1238_v20 = vld [vmem:[#allocation6 + $0x244] ss:$8 sps:$4 sm:$0xff]   ;;  %v1236_v23 = vld [vmem:[#allocation6 + $0x240] ss:$8 sps:$4 sm:$0xff]   ;;  %v1244_v24 = vld [vmem:[#allocation6 + $0x254] ss:$8 sps:$4 sm:$0xff]   ;;  %p1313_p0 = scmp.lt.s32.totalorder %s966_s29, %s966_s29 }
  0x3e   :  { %575 = vmatpush1.bf16.msra.mxu1 %v1193_v32  ;;  %v1259_v25 = vld [vmem:[%s1504_s4 + $0x10] sm:$0xff]   ;;  %v1250_v28 = vld [vmem:[#allocation6 + $0x264] ss:$8 sps:$4 sm:$0xff]   ;;  %v1261_v29 = vld [vmem:[%s1504_s4 + $0x18] sm:$0xff]  }
  0x3f   :  { %576 = vmatprep.subr.bf16.mxu1 %v1197_v33  ;;  %v1253_v32 = vld [vmem:[#allocation6 + $0x274] ss:$8 sps:$4 sm:$0xff]   ;;  %v1251_v33 = vld [vmem:[#allocation6 + $0x270] ss:$8 sps:$4 sm:$0xff]   ;;  %v64_v34 = vld [vmem:[%s1501_s1 + $0x20] sm:$0xff] }
  0x40   :  { %618 = vmatpush1.bf16.msra.mxu0 %v1160_v26  ;;  %v1260_v26 = vld [vmem:[%s1504_s4 + $0x58] sm:$0xff]   ;;  %v1263_v36 = vld [vmem:[%s1504_s4 + $0x20] sm:$0xff]  }
  0x41   :  { %619 = vmatprep.subr.bf16.mxu0 %v1164_v27  ;;  %v1242_v27 = vld [vmem:[#allocation6 + $0x250] ss:$8 sps:$4 sm:$0xff]   ;;  %v1056_v11 = vld [vmem:[%s1505_s5] ss:$0 sm:$0xff]  ;;  %s1308_s5 = scalar_lea.vmem %s966_s29, 128 }
  0x42   :  { %577 = vmatpush1.bf16.msra.mxu1 %v1199_v38  ;;  %v1265_v38 = vld [vmem:[%s1504_s4 + $0x28] sm:$0xff]   ;;  %p1309_p13 = scmp.ne.s32.totalorder %s966_s29, %s1308_s5  ;;  %p1314_p1 = scmp.lt.s32.totalorder %s1308_s5, %s1308_s5 }
  0x43   :  { %578 = vmatprep.subr.bf16.mxu1 %v1203_v39  ;;  %v1266_v39 = vld [vmem:[%s1504_s4 + $0x70] sm:$0xff]  }
  0x44   :  { %620 = vmatpush1.bf16.msra.mxu0 %v1166_v30  ;;  %v1262_v30 = vld [vmem:[%s1504_s4 + $0x60] sm:$0xff]   ;;  %p1315_p2 = por %p1314_p1, %p1313_p0 }
  0x45   :  { %621 = vmatprep.subr.bf16.mxu0 %v1170_v31  ;;  %v1248_v31 = vld [vmem:[#allocation6 + $0x260] ss:$8 sps:$4 sm:$0xff]  }
  0x46   :  { %579 = vmatpush1.bf16.msra.mxu1 %v1205_v42  ;;  %v1269_v42 = vld [vmem:[%s1504_s4 + $0x38] sm:$0xff]   ;;  %p1316_p3 = pnand %p1315_p2, %p1309_p13 }
  0x47   :  { %580 = vmatprep.subr.bf16.mxu1 %v1209_v43  ;;  %v1341_v43 = vmov 0.0  }
  0x48   :  { %622 = vmatpush1.bf16.msra.mxu0 %v1172_v35  ;;  %v69_v35 = vpack.c.bf16 %v64_v34, %v64_v34 }
  0x49   :  { %623 = vmatprep.subr.bf16.mxu0 %v1176_v37  ;;  %v1264_v37 = vld [vmem:[%s1504_s4 + $0x68] sm:$0xff]  }
  0x4a   :  { %581 = vmatpush1.bf16.msra.mxu1 %v1211_v46 }
  0x4b   :  { %582 = vmatprep.subr.bf16.mxu1 %v1215_v47  ;;  %v152_v47 = vlaneseq }
  0x4c   :  { %624 = vmatpush1.bf16.msra.mxu0 %v1178_v40  ;;  %v1267_v40 = vld [vmem:[%s1504_s4 + $0x30] sm:$0xff]  }
  0x4d   :  { %625 = vmatprep.subr.bf16.mxu0 %v1182_v41  ;;  %v1268_v41 = vld [vmem:[%s1504_s4 + $0x78] sm:$0xff]  }
  0x4e   :  { %583 = vmatpush1.bf16.msra.mxu1 %v1217_v50 }
  0x4f   :  { %584 = vmatprep.subr.bf16.mxu1 %v1221_v51  ;;  %v150_v51 = vld [vmem:[%s1503_s3] sm:$0x3] }
  0x50   :  { %626 = vmatpush1.bf16.msra.mxu0 %v1184_v44 }
  0x51   :  { %627 = vmatprep.subr.bf16.mxu0 %v1188_v45 }
  0x52   :  { %585 = vmatpush1.bf16.msra.mxu1 %v1223_v55 }
  0x53   :  { %586 = vmatprep.subr.bf16.mxu1 %v1227_v57 }
  0x54   :  { %628 = vmatpush1.bf16.msra.mxu0 %v1190_v48 }
  0x55   :  { %629 = vmatprep.subr.bf16.mxu0 %v1194_v49  ;;  %v153_v49 = vshrl.u32 %v152_v47, 7 }
  0x56   :  { %587 = vmatpush1.bf16.msra.mxu1 %v1229_v61 }
  0x57   :  { %588 = vmatprep.subr.bf16.mxu1 %v1233_v62  ;;  %v154_v50 = vsub.s32 0, %v153_v49 }
  0x58   :  { %630 = vmatpush1.bf16.msra.mxu0 %v1196_v52  ;;  %v158_v52 = vsub.s32 1, %v153_v49 }
  0x59   :  { %631 = vmatprep.subr.bf16.mxu0 %v1200_v53  ;;  %v155_v53 = vrot.slane %v150_v51, %v154_v50 }
  0x5a   :  { %589 = vmatpush1.bf16.msra.mxu1 %v1235_v2  ;;  %v159_v54 = vrot.slane %v150_v51, %v158_v52 }
  0x5b   :  { %590 = vmatprep.subr.bf16.mxu1 %v1239_v5  ;;  %v1270_v5 = vld [vmem:[%s1506_s6] sm:$0xff]  }
  0x5c   :  { %632 = vmatpush1.bf16.msra.mxu0 %v1202_v58  ;;  %v687_v58 = vstv %s58_s18 }
  0x5d   :  { %633 = vmatprep.subr.bf16.mxu0 %v1206_v59 }
  0x5e   :  { %591 = vmatpush1.bf16.msra.mxu1 %v1241_v6 }
  0x5f   :  { %592 = vmatprep.subr.bf16.mxu1 %v1245_v7  ;;  %v1271_v7 = vld [vmem:[%s1506_s6 + $0x8] sm:$0xff]  }
  0x60   :  { %634 = vmatpush1.bf16.msra.mxu0 %v1208_v60 }
  0x61   :  { %644 = vmatprep.subr.bf16.mxu0 %v1214_v0 }
  0x62   :  { %593 = vmatpush1.bf16.msra.mxu1 %v1247_v10 }
  0x63   :  { %636 = vmatmul.mubr.bf16.vlgmr.msra.gmra.mrb[0].mxu0 %v67_v3  ;;  %1079 = vmatprep.subr.bf16.mxu1 %v1254_v13 }
  0x64   :  { %645 = vmatpush1.bf16.msra.mxu0 %v1212_v1  ;;  %676 = vmatprep.mubr.bf16.mxu0 %v1340_v12 }
  0x65   :  { %646 = vmatprep.subr.bf16.mxu0 %v1220_v4  ;;  %595 = vmatmul.mubr.bf16.vlgmr.msra.gmra.mrb[0].mxu1 %v65_v16 }
  0x66   :  { %1080 = vmatpush3.bf16.msra.mxu1 %v1255_v17 }
  0x67   :  { %1081 = vmatprep.subr.bf16.mxu1 %v1256_v18 }
  0x68   :  { %647 = vmatpush1.bf16.msra.mxu0 %v1218_v8  ;;  %v1272_v8 = vld [vmem:[%s1506_s6 + $0x10] sm:$0xff]  }
  0x69   :  { %648 = vmatprep.subr.bf16.mxu0 %v1226_v9  ;;  %v1273_v9 = vld [vmem:[%s1506_s6 + $0x18] sm:$0xff]  }
  0x6a   :  { %1082 = vmatpush3.bf16.msra.mxu1 %v1257_v21  ;;  %v1073_v21 = vld [vmem:[%s1507_s7] ss:$0 sm:$0xff] }
  0x6b   :  { %1083 = vmatprep.subr.bf16.mxu1 %v1258_v22 }
  0x6c   :  { %649 = vmatpush1.bf16.msra.mxu0 %v1224_v14 }
  0x6d   :  { %650 = vmatprep.subr.bf16.mxu0 %v1232_v15  ;;  %v870_v15 = vstv %s975_s24 }
  0x6e   :  { %1084 = vmatpush3.bf16.msra.mxu1 %v1259_v25 }
  0x6f   :  { %1085 = vmatprep.subr.bf16.mxu1 %v1260_v26 }
  0x70   :  { %651 = vmatpush1.bf16.msra.mxu0 %v1230_v19 }
  0x71   :  { %652 = vmatprep.subr.bf16.mxu0 %v1238_v20 }
  0x72   :  { %1086 = vmatpush3.bf16.msra.mxu1 %v1261_v29 }
  0x73   :  { %1087 = vmatprep.subr.bf16.mxu1 %v1262_v30 }
  0x74   :  { %653 = vmatpush1.bf16.msra.mxu0 %v1236_v23 }
  0x75   :  { %654 = vmatprep.subr.bf16.mxu0 %v1244_v24 }
  0x76   :  { %1088 = vmatpush3.bf16.msra.mxu1 %v1263_v36 }
  0x77   :  { %1089 = vmatprep.subr.bf16.mxu1 %v1264_v37 }
  0x78   :  { %655 = vmatpush1.bf16.msra.mxu0 %v1242_v27 }
  0x79   :  { %656 = vmatprep.subr.bf16.mxu0 %v1250_v28 }
  0x7a   :  { %1090 = vmatpush3.bf16.msra.mxu1 %v1265_v38 }
  0x7b   :  { %1091 = vmatprep.subr.bf16.mxu1 %v1266_v39 }
  0x7c   :  { %657 = vmatpush1.bf16.msra.mxu0 %v1248_v31 }
  0x7d   :  { %658 = vmatprep.subr.bf16.mxu0 %v1253_v32 }
  0x7e   :  { %1092 = vmatpush3.bf16.msra.mxu1 %v1267_v40 }
  0x7f   :  { %1093 = vmatprep.subr.bf16.mxu1 %v1268_v41 }
  0x80   :  { %659 = vmatpush1.bf16.msra.mxu0 %v1251_v33 }
  0x82   :  { %1094 = vmatpush3.bf16.msra.mxu1 %v1269_v42 }
  0x83   :  { %677 = vmatmul.mubr.bf16.vlgmr.msra.gmra.mrb[0].mxu0 %v69_v35  ;;  %1106 = vmatprep.subr.bf16.mxu1 %v1341_v43 }
 0x138   :  { %v596_v44 = vpop.f32.mrb[0].mxu1 }
 0x139   :  { %v598_v45 = vpop.f32.mrb[1].mxu1  ;;  %v597_v55 = vadd.f32 %v596_v44, %v155_v53 }
 0x13a   :  { %v600_v46 = vpop.f32.mrb[2].mxu1  ;;  %v599_v56 = vadd.f32 %v598_v45, %v159_v54 }
 0x13b   :  { %v601_v48 = vpop.f32.mrb[3].mxu1 }
 0x156   :  { %v678_v57 = vpop.f32.mrb[0].mxu0 }
 0x157   :  { %v1119_v59 = vadd.f32 %v678_v57, %v597_v55  ;;  %v680_v60 = vpop.f32.mrb[1].mxu0 }
 0x158   :  { %v1121_v61 = vadd.f32 %v680_v60, %v599_v56  ;;  %v682_v62 = vpop.f32.mrb[2].mxu0 }
 0x159   :  { %vm685_vm0 = vcmp.gt.f32.partialorder %v1119_v59, 0.0  ;;  %v688_v63 = vmul.f32 %v1119_v59, %v687_v58  ;;  %v683_v0 = vpop.f32.mrb[3].mxu0 }
 0x15a   :  { %vm686_vm1 = vcmp.gt.f32.partialorder %v1121_v61, 0.0  ;;  %v689_v1 = vmul.f32 %v1121_v61, %v687_v58 }
 0x15b   :  { %v690_v2 = vsel %vm685_vm0, %v1119_v59, %v688_v63 }
 0x15c   :  { %v691_v3 = vsel %vm686_vm1, %v1121_v61, %v689_v1  ;;  %v692_v6 = vpack.c.bf16 %v690_v2, %v690_v2 }
 0x15d   :  { %v693_v4 = vpack.c.bf16 %v691_v3, %v691_v3 }
 0x15f   :  { %861 = vmatprep.mubr.bf16.mxu1 %v693_v4 }
 0x160   :  { %862 = vmatmul.mubr.bf16.vlgmr.msra.gmra.mrb[4].mxu1 %v692_v6 }
 0x161   :  { %1107 = vmatpush3.bf16.msra.mxu1 %v1270_v5  ;;  %1114 = vmatprep.mubr.msk.bf16.mxu1 %vm1342_vm2, %v1341_v43 }
 0x162   :  { %1108 = vmatprep.subr.bf16.mxu1 %v1341_v43 }
 0x165   :  { %1109 = vmatpush3.bf16.msra.mxu1 %v1271_v7 }
 0x166   :  { %1110 = vmatprep.subr.bf16.mxu1 %v1341_v43 }
 0x169   :  { %1111 = vmatpush3.bf16.msra.mxu1 %v1272_v8 }
 0x16a   :  { %1112 = vmatprep.subr.bf16.mxu1 %v1341_v43 }
 0x16d   :  { %1113 = vmatpush3.bf16.msra.mxu1 %v1273_v9 }
 0x233   :  { %v1095_v10 = vpop.f32.mrb[4].mxu1 }
 0x234   :  { %v1096_v12 = vpop.f32.mrb[5].mxu1 }
 0x235   :  { %v1097_v13 = vadd.f32 %v1096_v12, %v1095_v10  ;;  %v1098_v14 = vpop.f32.mrb[6].mxu1 }
 0x236   :  { %v1099_v16 = vpop.f32.mrb[7].mxu1 }
 0x237   :  { %v864_v17 = vadd.f32 %v1097_v13, %v1056_v11 }
 0x239   :  { %vm869_vm3 = vcmp.gt.f32.partialorder %v864_v17, 0.0  ;;  %v871_v18 = vmul.f32 %v870_v15, %v864_v17 }
 0x23b   :  { %v872_v19 = vsel %vm869_vm3, %v864_v17, %v871_v18 }
 0x23c   :  { %v873_v20 = vpack.c.bf16 %v872_v19, %v872_v19 }
 0x23e   :  { %1115 = vmatmul.mubr.msk.bf16.vlgmr.msra.gmra.mrb[8].mxu1 %vm913_vm4, %v873_v20 }
 0x311   :  { %v951_v22 = vpop.f32.mrb[8].mxu1 }
 0x312   :  { %v952_v23 = vadd.f32 %v1073_v21, %v951_v22  ;;  %v1116_v24 = vpop.f32.mrb[9].mxu1 }
 0x313   :  { %v954_v25 = vpop.f32.mrb[10].mxu1 }
 0x314   :  { %v1117_v26 = vpop.f32.mrb[11].mxu1  ;;  %958 = vst.msk [vmem:[#allocation7] sm:$0xff] %vm957_vm5, %v952_v23 }
 0x315   :  { %1319 = shalt.err (!%p1316_p3)
}
 0x316   :  { %s1320_s7 = scalar_lea.hbm %s1508_s8, 128 }
 0x317   :  { %p1321_p4 = scmp.ne.s32.totalorder %s1508_s8, %s1320_s7  ;;  %p1324_p5 = scmp.lt.u32.totalorder %s1320_s7, %s1508_s8 }
 0x319   :  { %p1326_p6 = pnand %p1324_p5, %p1321_p4 }
 0x31b   :  { %1329 = shalt.err (!%p1326_p6)
}
 0x31c   :  { %968 = dma.vmem_to_hbm [thread:$0]  %s966_s29, 128, %s1508_s8, [#allocation4]  }
 0x31d   :  { %1334 = dma.done.wait [#allocation4], 128  }
 0x31e   :  { %1335 = vsyncadd [#allocation4], 4294967168 }
 0x31f   :  { %972 = vsyncpa [#allocation3], 1 }
 0x320   :  { %973 = vsyncpa [#allocation4], 1 }
 0x321   :  { %974 = vsyncpa [#allocation5], 1 }

</bundles_post_ra>
